<compile_context>
chip_gen: v5e
topology: v5e:2x2
jax: 0.10.0
libtpu: 0.0.40
codegen_flags: <defaults>
</compile_context>

<pallas_src>
import jax
import jax.numpy as jnp
from jax.experimental import pallas as pl
from jax.experimental.pallas import tpu as pltpu


def _round_up(x, m):
    return (x + m - 1) // m * m


def dnn_kernel(x_ref, w1_ref, b1_ref, w2_ref, b2_ref, w3_ref, b3_ref, o_ref):
    # x_ref: [TM, img_size] bf16; weights bf16; biases f32; out [TM, 128] f32.
    x = x_ref[...]

    # fc1 + relu  -> [TM, 1024]   (MXU bf16 x bf16 -> f32 accumulate)
    h1 = jnp.dot(x, w1_ref[...], preferred_element_type=jnp.float32)
    h1 = jnp.maximum(h1 + b1_ref[...], 0.0)

    # fc2 + relu  -> [TM, 128]
    h2 = jnp.dot(h1.astype(jnp.bfloat16), w2_ref[...],
                 preferred_element_type=jnp.float32)
    h2 = jnp.maximum(h2 + b2_ref[...], 0.0)

    # fc3 (lane-padded to 128 columns; real outputs live in [:, :2])
    out = jnp.dot(h2.astype(jnp.bfloat16), w3_ref[...],
                  preferred_element_type=jnp.float32)
    o_ref[...] = (out + b3_ref[...]).astype(o_ref.dtype)


def dnn_forward(x, params, *, tm=256):
    """x: any shape whose trailing dims flatten to img_size (like torch .view)."""
    w1, b1, w2, b2, w3, b3 = params
    img_size = w1.shape[0]
    out_dim = w3.shape[1]  # 2

    x2d = x.reshape(-1, img_size)  # same semantics as torch .view(-1, img_size)
    B = x2d.shape[0]

    # Batch tile: sublane-aligned (multiple of 8); don't over-tile tiny batches.
    tm = min(tm, _round_up(max(B, 8), 8))
    Bp = _round_up(B, tm)
    if Bp != B:
        x2d = jnp.pad(x2d, ((0, Bp - B), (0, 0)))

    # Lane-dense fc3: pad output width 2 -> 128 with zero columns.
    N3 = 128
    w3p = jnp.zeros((w3.shape[0], N3), w3.dtype).at[:, :out_dim].set(w3)
    b3p = jnp.zeros((1, N3), b3.dtype).at[:, :out_dim].set(b3)

    # bf16 matmul operands; biases stay f32 (accum + elementwise in f32).
    xb = x2d.astype(jnp.bfloat16)
    w1b = w1.astype(jnp.bfloat16)
    w2b = w2.astype(jnp.bfloat16)
    w3b = w3p.astype(jnp.bfloat16)

    grid = (Bp // tm,)

    # Weights/biases: same block every iteration -> stay VMEM resident.
    def resident(shape):
        return pl.BlockSpec(shape, lambda i: (0, 0))

    flops = 2 * Bp * (img_size * w1.shape[1] + w1.shape[1] * w2.shape[1]
                      + w2.shape[1] * N3)
    bytes_accessed = (xb.size * 2 + w1b.size * 2 + w2b.size * 2 + w3b.size * 2
                      + b1.size * 4 + b2.size * 4 + b3p.size * 4
                      + Bp * N3 * 4)

    out = pl.pallas_call(
        dnn_kernel,
        out_shape=jax.ShapeDtypeStruct((Bp, N3), jnp.float32),
        grid_spec=pltpu.PrefetchScalarGridSpec(
            num_scalar_prefetch=0,
            grid=grid,
            in_specs=[
                pl.BlockSpec((tm, img_size), lambda i: (i, 0)),  # x tile
                resident(w1b.shape), resident(b1.shape),
                resident(w2b.shape), resident(b2.shape),
                resident(w3b.shape), resident(b3p.shape),
            ],
            out_specs=pl.BlockSpec((tm, N3), lambda i: (i, 0)),
        ),
        compiler_params=pltpu.CompilerParams(
            dimension_semantics=("parallel",),
        ),
        cost_estimate=pl.CostEstimate(
            flops=flops, transcendentals=0, bytes_accessed=bytes_accessed),
    )(xb, w1b, b1, w2b, b2, w3b, b3p)

    # Strip batch padding and lane padding.
    return out[:B, :out_dim]


def init_params(key, img_size):
    """Deterministic init mimicking nn.Linear's U(-1/sqrt(fan_in), 1/sqrt(fan_in))."""
    dims = [(img_size, 64 * 4 * 4), (64 * 4 * 4, 128), (128, 2)]
    params = []
    for fan_in, fan_out in dims:
        kw, kb, key = jax.random.split(key, 3)
        bound = 1.0 / (fan_in ** 0.5)
        w = jax.random.uniform(kw, (fan_in, fan_out), jnp.float32, -bound, bound)
        b = jax.random.uniform(kb, (1, fan_out), jnp.float32, -bound, bound)
        params.extend([w, b])
    return tuple(params)


if __name__ == "__main__":
    key = jax.random.PRNGKey(0)
    kx, kp = jax.random.split(key)

    # Small example: batch=2, single-channel 16x16 image -> img_size = 256.
    B, C, H, W = 2, 1, 16, 16
    img_size = C * H * W
    x = jax.random.normal(kx, (B, C, H, W), jnp.float32)

    params = init_params(kp, img_size)

    out = dnn_forward(x, params)
    out = jax.block_until_ready(out)
    assert out.shape == (B, 2), out.shape

    # Reference in plain JAX, replicating the kernel's bf16-operand / f32-accum
    # precision so the comparison is tight.
    w1, b1, w2, b2, w3, b3 = params
    xr = x.reshape(-1, img_size).astype(jnp.bfloat16)
    h1 = jnp.maximum(
        jnp.dot(xr, w1.astype(jnp.bfloat16),
                preferred_element_type=jnp.float32) + b1, 0.0)
    h2 = jnp.maximum(
        jnp.dot(h1.astype(jnp.bfloat16), w2.astype(jnp.bfloat16),
                preferred_element_type=jnp.float32) + b2, 0.0)
    ref = jnp.dot(h2.astype(jnp.bfloat16), w3.astype(jnp.bfloat16),
                  preferred_element_type=jnp.float32) + b3
    assert jnp.allclose(out, ref, atol=2e-3, rtol=2e-3), (out, ref)

    # Loose sanity check against the full-f32 reference as well.
    h1f = jnp.maximum(x.reshape(-1, img_size) @ w1 + b1, 0.0)
    h2f = jnp.maximum(h1f @ w2 + b2, 0.0)
    reff = h2f @ w3 + b3
    assert jnp.allclose(out, reff, atol=5e-2, rtol=5e-2)

    print("KERNEL_OK")
</pallas_src>

<mosaic_0001>
module attributes {stable_mosaic.version = 11 : i64} {
  func.func @dnn_kernel(%arg0: i32, %arg1: memref<8x256xbf16, #tpu.memory_space<vmem>>, %arg2: memref<256x1024xbf16, #tpu.memory_space<vmem>>, %arg3: memref<1x1024xf32, #tpu.memory_space<vmem>>, %arg4: memref<1024x128xbf16, #tpu.memory_space<vmem>>, %arg5: memref<1x128xf32, #tpu.memory_space<vmem>>, %arg6: memref<128x128xbf16, #tpu.memory_space<vmem>>, %arg7: memref<1x128xf32, #tpu.memory_space<vmem>>, %arg8: memref<8x128xf32, #tpu.memory_space<vmem>>) attributes {dimension_semantics = [#tpu.dimension_semantics<parallel>], iteration_bounds = array<i64: 1>, scalar_prefetch = 0 : i64, scratch_operands = 0 : i64, tpu.core_type = #tpu.core_type<tc>, window_params = [{transform_indices = @transform_0, window_bounds = array<i64: 8, 256>}, {pipeline_mode = #tpu.pipeline_mode<synchronous>, transform_indices = @transform_1, window_bounds = array<i64: 256, 1024>}, {pipeline_mode = #tpu.pipeline_mode<synchronous>, transform_indices = @transform_2, window_bounds = array<i64: 1, 1024>}, {pipeline_mode = #tpu.pipeline_mode<synchronous>, transform_indices = @transform_3, window_bounds = array<i64: 1024, 128>}, {pipeline_mode = #tpu.pipeline_mode<synchronous>, transform_indices = @transform_4, window_bounds = array<i64: 1, 128>}, {pipeline_mode = #tpu.pipeline_mode<synchronous>, transform_indices = @transform_5, window_bounds = array<i64: 128, 128>}, {pipeline_mode = #tpu.pipeline_mode<synchronous>, transform_indices = @transform_6, window_bounds = array<i64: 1, 128>}, {transform_indices = @transform_7, window_bounds = array<i64: 8, 128>}]} {
    %c0 = arith.constant 0 : index
    %c0_0 = arith.constant 0 : index
    %0 = vector.load %arg1[%c0, %c0_0] : memref<8x256xbf16, #tpu.memory_space<vmem>>, vector<8x256xbf16>
    %c0_1 = arith.constant 0 : index
    %c0_2 = arith.constant 0 : index
    %1 = vector.load %arg2[%c0_1, %c0_2] : memref<256x1024xbf16, #tpu.memory_space<vmem>>, vector<256x1024xbf16>
    %cst = arith.constant dense<0.000000e+00> : vector<8x1024xf32>
    %2 = tpu.matmul %0, %1, %cst {dimension_numbers = #tpu.dot_dimension_numbers<[1], [0], [0], [1], [0, 0, 1, 1], [], []>} : vector<8x256xbf16>, vector<256x1024xbf16>, vector<8x1024xf32> -> vector<8x1024xf32>
    %c0_3 = arith.constant 0 : index
    %c0_4 = arith.constant 0 : index
    %3 = vector.load %arg3[%c0_3, %c0_4] : memref<1x1024xf32, #tpu.memory_space<vmem>>, vector<1x1024xf32>
    %4 = vector.broadcast %3 : vector<1x1024xf32> to vector<8x1024xf32>
    %5 = arith.addf %2, %4 : vector<8x1024xf32>
    %cst_5 = arith.constant 0.000000e+00 : f32
    %6 = vector.broadcast %cst_5 : f32 to vector<8x1024xf32>
    %7 = arith.maximumf %5, %6 : vector<8x1024xf32>
    %8 = arith.truncf %7 : vector<8x1024xf32> to vector<8x1024xbf16>
    %c0_6 = arith.constant 0 : index
    %c0_7 = arith.constant 0 : index
    %9 = vector.load %arg4[%c0_6, %c0_7] : memref<1024x128xbf16, #tpu.memory_space<vmem>>, vector<1024x128xbf16>
    %cst_8 = arith.constant dense<0.000000e+00> : vector<8x128xf32>
    %10 = tpu.matmul %8, %9, %cst_8 {dimension_numbers = #tpu.dot_dimension_numbers<[1], [0], [0], [1], [0, 0, 1, 1], [], []>} : vector<8x1024xbf16>, vector<1024x128xbf16>, vector<8x128xf32> -> vector<8x128xf32>
    %c0_9 = arith.constant 0 : index
    %c0_10 = arith.constant 0 : index
    %11 = vector.load %arg5[%c0_9, %c0_10] : memref<1x128xf32, #tpu.memory_space<vmem>>, vector<1x128xf32>
    %12 = vector.broadcast %11 : vector<1x128xf32> to vector<8x128xf32>
    %13 = arith.addf %10, %12 : vector<8x128xf32>
    %cst_11 = arith.constant 0.000000e+00 : f32
    %14 = vector.broadcast %cst_11 : f32 to vector<8x128xf32>
    %15 = arith.maximumf %13, %14 : vector<8x128xf32>
    %16 = arith.truncf %15 : vector<8x128xf32> to vector<8x128xbf16>
    %c0_12 = arith.constant 0 : index
    %c0_13 = arith.constant 0 : index
    %17 = vector.load %arg6[%c0_12, %c0_13] : memref<128x128xbf16, #tpu.memory_space<vmem>>, vector<128x128xbf16>
    %cst_14 = arith.constant dense<0.000000e+00> : vector<8x128xf32>
    %18 = tpu.matmul %16, %17, %cst_14 {dimension_numbers = #tpu.dot_dimension_numbers<[1], [0], [0], [1], [0, 0, 1, 1], [], []>} : vector<8x128xbf16>, vector<128x128xbf16>, vector<8x128xf32> -> vector<8x128xf32>
    %c0_15 = arith.constant 0 : index
    %c0_16 = arith.constant 0 : index
    %19 = vector.load %arg7[%c0_15, %c0_16] : memref<1x128xf32, #tpu.memory_space<vmem>>, vector<1x128xf32>
    %20 = vector.broadcast %19 : vector<1x128xf32> to vector<8x128xf32>
    %21 = arith.addf %18, %20 : vector<8x128xf32>
    %c0_17 = arith.constant 0 : index
    %c0_18 = arith.constant 0 : index
    %22 = vector.load %arg8[%c0_17, %c0_18] : memref<8x128xf32, #tpu.memory_space<vmem>>, vector<8x128xf32>
    tpu.vector_store %arg8[%c0_17, %c0_18], %21 {strides = array<i32>} : memref<8x128xf32, #tpu.memory_space<vmem>>, vector<8x128xf32>,
    return
  }
  func.func @transform_0(%arg0: i32) -> (i32, i32) {
    %c0_i32 = arith.constant 0 : i32
    %c0_i32_0 = arith.constant 0 : i32
    return %arg0, %c0_i32 : i32, i32
  }
  func.func @transform_1(%arg0: i32) -> (i32, i32) {
    %c0_i32 = arith.constant 0 : i32
    %c0_i32_0 = arith.constant 0 : i32
    %c0_i32_1 = arith.constant 0 : i32
    return %c0_i32, %c0_i32_0 : i32, i32
  }
  func.func @transform_2(%arg0: i32) -> (i32, i32) {
    %c0_i32 = arith.constant 0 : i32
    %c0_i32_0 = arith.constant 0 : i32
    %c0_i32_1 = arith.constant 0 : i32
    return %c0_i32, %c0_i32_0 : i32, i32
  }
  func.func @transform_3(%arg0: i32) -> (i32, i32) {
    %c0_i32 = arith.constant 0 : i32
    %c0_i32_0 = arith.constant 0 : i32
    %c0_i32_1 = arith.constant 0 : i32
    return %c0_i32, %c0_i32_0 : i32, i32
  }
  func.func @transform_4(%arg0: i32) -> (i32, i32) {
    %c0_i32 = arith.constant 0 : i32
    %c0_i32_0 = arith.constant 0 : i32
    %c0_i32_1 = arith.constant 0 : i32
    return %c0_i32, %c0_i32_0 : i32, i32
  }
  func.func @transform_5(%arg0: i32) -> (i32, i32) {
    %c0_i32 = arith.constant 0 : i32
    %c0_i32_0 = arith.constant 0 : i32
    %c0_i32_1 = arith.constant 0 : i32
    return %c0_i32, %c0_i32_0 : i32, i32
  }
  func.func @transform_6(%arg0: i32) -> (i32, i32) {
    %c0_i32 = arith.constant 0 : i32
    %c0_i32_0 = arith.constant 0 : i32
    %c0_i32_1 = arith.constant 0 : i32
    return %c0_i32, %c0_i32_0 : i32, i32
  }
  func.func @transform_7(%arg0: i32) -> (i32, i32) {
    %c0_i32 = arith.constant 0 : i32
    %c0_i32_0 = arith.constant 0 : i32
    return %arg0, %c0_i32 : i32, i32
  }
}

</mosaic_0001>

<bundles_post_ra>
// kernel: tpu_custom_call.1
= control target key start
LH: loop header
LB: loop body
LE: loop exit
PB: predicated region body
PF: predicated region fallthrough
CT: control target
= control target key end

     0   :  { %12 = vsyncpa [#allocation3], 0  ;;  %s3110_s0 = inlined_call_operand.hbm [shape: bf16[8,256], index: 0, kind: input, shape index: {}]   ;;  %s3111_s1 = inlined_call_operand.hbm [shape: bf16[256,1024], index: 1, kind: input, shape index: {}]   ;;  %s3112_s2 = inlined_call_operand.hbm [shape: f32[1,1024], index: 2, kind: input, shape index: {}]   ;;  %s3113_s3 = inlined_call_operand.hbm [shape: bf16[1024,128], index: 3, kind: input, shape index: {}]   ;;  %s3114_s4 = inlined_call_operand.vmem [shape: f32[1,128], index: 4, kind: input, shape index: {}]   ;;  %s3115_s5 = inlined_call_operand.hbm [shape: bf16[128,128], index: 5, kind: input, shape index: {}]   ;;  %s3116_s6 = inlined_call_operand.vmem [shape: f32[1,128], index: 6, kind: input, shape index: {}]   ;;  %s3117_s7 = inlined_call_operand.hbm [shape: f32[8,128], index: 7, kind: output, shape index: {}]  }
   0x1   :  { %13 = vsyncpa [#allocation6], 0 }
   0x2   :  { %14 = vsyncpa [#allocation9], 0  ;;  %s31_s26 = sshll.u32 %s3111_s1, 4  ;;  %s32_s26 = int_to_ptr.hbm [resolvable:$true] %s31_s26 }
   0x3   :  { %15 = vsyncpa [#allocation4], 0  ;;  %s3006_s27 = smov [#allocation5]   ;;  %s55_s8 = sshll.u32 %s3113_s3, 4  ;;  %s56_s8 = int_to_ptr.hbm [resolvable:$true] %s55_s8 }
   0x4   :  { %s33_s28 = sshll.u32 %s3006_s27, 4  ;;  %s3007_s9 = smov 512   ;;  %s34_s28 = int_to_ptr.vmem [resolvable:$true] %s33_s28 }
   0x5   :  { %s3008_s10 = smov 32   ;;  %s3009_s11 = smov [#allocation8]  }
   0x6   :  { %39 = dma.hbm_to_vmem [thread:$0]  %s32_s26, 16384, %s34_s28, [#allocation6], %s3007_s9, %s3007_s9, %s3008_s10  }
   0x7   :  { %s57_s12 = sshll.u32 %s3009_s11, 4  ;;  %s3010_s13 = smov 64   ;;  %s58_s12 = int_to_ptr.vmem [resolvable:$true] %s57_s12 }
   0x8   :  { %s3011_s14 = smov 4   ;;  %s21_s16 = sshll.u32 %s3110_s0, 4  ;;  %s22_s16 = int_to_ptr.hbm [resolvable:$true] %s21_s16 }
   0x9   :  { %63 = dma.hbm_to_vmem [thread:$0]  %s56_s8, 8192, %s58_s12, [#allocation9], %s3010_s13, %s3010_s13, %s3011_s14  }
   0xa   :  { %s3012_s17 = smov [#allocation2]   ;;  %s45_s20 = sshll.u32 %s3112_s2, 4  ;;  %s46_s20 = int_to_ptr.hbm [resolvable:$true] %s45_s20 }
   0xb   :  { %s23_s18 = sshll.u32 %s3012_s17, 4  ;;  %s3013_s21 = smov [#allocation7]   ;;  %s24_s18 = int_to_ptr.vmem [resolvable:$true] %s23_s18 }
   0xc   :  { %26 = dma.hbm_to_vmem [thread:$0]  %s22_s16, 128, %s24_s18, [#allocation3]  }
   0xd   :  { %s47_s22 = sshll.u32 %s3013_s21, 4  ;;  %s70_s25 = sshll.u32 %s3115_s5, 4  ;;  %s48_s22 = int_to_ptr.vmem [resolvable:$true] %s47_s22  ;;  %s71_s25 = int_to_ptr.hbm [resolvable:$true] %s70_s25 }
   0xe   :  { %50 = dma.hbm_to_vmem [thread:$0]  %s46_s20, 128, %s48_s22, [#allocation6]  }
   0xf   :  { %s3014_s0 = smov [#allocation10]  }
  0x10   :  { %s72_s26 = sshll.u32 %s3014_s0, 4  ;;  %s73_s26 = int_to_ptr.vmem [resolvable:$true] %s72_s26 }
  0x11   :  { %78 = dma.hbm_to_vmem [thread:$0]  %s71_s25, 1024, %s73_s26, [#allocation9], %s3010_s13, %s3010_s13, %s3011_s14  }
  0x12   :  { %2998 = dma.done.wait [#allocation3], 128  }
  0x13   :  { %2999 = vsyncadd [#allocation3], 4294967168 }
  0x14   :  { %3000 = dma.done.wait [#allocation6], 16512  }
  0x15   :  { %3001 = vsyncadd [#allocation6], 4294950784 }
  0x16   :  { %3002 = dma.done.wait [#allocation9], 9216  }
  0x17   :  { %3003 = vsyncadd [#allocation9], 4294958080  ;;  %v2068_v0 = vld [vmem:[#allocation5 + $0x1c0] sm:$0xf]  ;;  %v2698_v5 = vld [vmem:[#allocation5 + $0x1c4] sm:$0xf] }
  0x18   :  { %v2702_v1 = vld [vmem:[#allocation5 + $0x1dc] sm:$0xf0]  ;;  %v2070_v6 = vld [vmem:[#allocation5 + $0x1e0] sm:$0xf0]  ;;  %s3015_s28 = smov [#allocation11]   ;;  %s1830_s9 = sshll.u32 %s3117_s7, 4  ;;  %s1831_s9 = int_to_ptr.hbm [resolvable:$true] %s1830_s9 }
  0x19   :  { %v2324_v2 = vld [vmem:[#allocation5 + $0x3c0] sm:$0xf]  ;;  %v2069_v3 = vor.u32 %v2702_v1, %v2068_v0  ;;  %v2073_v8 = vor.u32 %v2698_v5, %v2070_v6  ;;  %v2762_v9 = vld [vmem:[#allocation5 + $0x3c4] sm:$0xf]  ;;  %s1828_s29 = sshll.u32 %s3015_s28, 4  ;;  %s1829_s29 = int_to_ptr.vmem [resolvable:$true] %s1828_s29 }
  0x1a   :  { %v2766_v4 = vld [vmem:[#allocation5 + $0x3dc] sm:$0xf0]  ;;  %v2326_v10 = vld [vmem:[#allocation5 + $0x3e0] sm:$0xf0] }
  0x1b   :  { %v2325_v7 = vor.u32 %v2766_v4, %v2324_v2  ;;  %v2036_v11 = vld [vmem:[#allocation5 + $0x180] sm:$0xf]  ;;  %895 = vmatpush.bf16.msra.mxu0 %v2069_v3  ;;  %v2329_v12 = vor.u32 %v2762_v9, %v2326_v10  ;;  %921 = vmatpush.bf16.msra.mxu2 %v2073_v8  ;;  %v2690_v18 = vld [vmem:[#allocation5 + $0x184] sm:$0xf] }
  0x1c   :  { %v2694_v13 = vld [vmem:[#allocation5 + $0x19c] sm:$0xf0]  ;;  %v2038_v19 = vld [vmem:[#allocation5 + $0x1a0] sm:$0xf0] }
  0x1d   :  { %v2292_v14 = vld [vmem:[#allocation5 + $0x380] sm:$0xf]  ;;  %908 = vmatpush.bf16.msra.mxu1 %v2325_v7  ;;  %v2037_v16 = vor.u32 %v2694_v13, %v2036_v11  ;;  %v2754_v20 = vld [vmem:[#allocation5 + $0x384] sm:$0xf]  ;;  %934 = vmatpush.bf16.msra.mxu3 %v2329_v12  ;;  %v2041_v21 = vor.u32 %v2690_v18, %v2038_v19 }
  0x1e   :  { %v2758_v15 = vld [vmem:[#allocation5 + $0x39c] sm:$0xf0]  ;;  %v2294_v22 = vld [vmem:[#allocation5 + $0x3a0] sm:$0xf0] }
  0x1f   :  { %v2293_v17 = vor.u32 %v2758_v15, %v2292_v14  ;;  %v2004_v23 = vld [vmem:[#allocation5 + $0x140] sm:$0xf]  ;;  %v2297_v25 = vor.u32 %v2754_v20, %v2294_v22  ;;  %v2682_v28 = vld [vmem:[#allocation5 + $0x144] sm:$0xf]  ;;  %896 = vmatpush.bf16.msra.mxu0 %v2037_v16  ;;  %922 = vmatpush.bf16.msra.mxu2 %v2041_v21 }
  0x20   :  { %v2686_v24 = vld [vmem:[#allocation5 + $0x15c] sm:$0xf0]  ;;  %v2006_v30 = vld [vmem:[#allocation5 + $0x160] sm:$0xf0] }
  0x21   :  { %v2260_v26 = vld [vmem:[#allocation5 + $0x340] sm:$0xf]  ;;  %v2005_v29 = vor.u32 %v2686_v24, %v2004_v23  ;;  %v2746_v31 = vld [vmem:[#allocation5 + $0x344] sm:$0xf]  ;;  %909 = vmatpush.bf16.msra.mxu1 %v2293_v17  ;;  %v2009_v34 = vor.u32 %v2682_v28, %v2006_v30  ;;  %935 = vmatpush.bf16.msra.mxu3 %v2297_v25  ;;  %v2076_v28 = vld [vmem:[#allocation5 + $0x1c8] sm:$0xf] }
  0x22   :  { %v2750_v27 = vld [vmem:[#allocation5 + $0x35c] sm:$0xf0]  ;;  %v2262_v32 = vld [vmem:[#allocation5 + $0x360] sm:$0xf0]  ;;  %v2332_v30 = vld [vmem:[#allocation5 + $0x3c8] sm:$0xf] }
  0x23   :  { %v2261_v33 = vor.u32 %v2750_v27, %v2260_v26  ;;  %v1972_v35 = vld [vmem:[#allocation5 + $0x100] sm:$0xf]  ;;  %v2265_v38 = vor.u32 %v2746_v31, %v2262_v32  ;;  %v2674_v40 = vld [vmem:[#allocation5 + $0x104] sm:$0xf]  ;;  %897 = vmatpush.bf16.msra.mxu0 %v2005_v29  ;;  %923 = vmatpush.bf16.msra.mxu2 %v2009_v34  ;;  %v2703_v29 = vld [vmem:[#allocation5 + $0x1e4] sm:$0xf0] }
  0x24   :  { %v2678_v36 = vld [vmem:[#allocation5 + $0x11c] sm:$0xf0]  ;;  %v1974_v41 = vld [vmem:[#allocation5 + $0x120] sm:$0xf0]  ;;  %v2767_v32 = vld [vmem:[#allocation5 + $0x3e4] sm:$0xf0] }
  0x25   :  { %v2228_v37 = vld [vmem:[#allocation5 + $0x300] sm:$0xf]  ;;  %v2738_v42 = vld [vmem:[#allocation5 + $0x304] sm:$0xf]  ;;  %v1973_v44 = vor.u32 %v2678_v36, %v1972_v35  ;;  %910 = vmatpush.bf16.msra.mxu1 %v2261_v33  ;;  %v1977_v46 = vor.u32 %v2674_v40, %v1974_v41  ;;  %936 = vmatpush.bf16.msra.mxu3 %v2265_v38  ;;  %v2699_v33 = vld [vmem:[#allocation5 + $0x1cc] sm:$0xf]  ;;  %v2077_v40 = vor.u32 %v2703_v29, %v2076_v28 }
  0x26   :  { %v2742_v39 = vld [vmem:[#allocation5 + $0x31c] sm:$0xf0]  ;;  %v2230_v43 = vld [vmem:[#allocation5 + $0x320] sm:$0xf0]  ;;  %v2078_v34 = vld [vmem:[#allocation5 + $0x1e8] sm:$0xf0]  ;;  %v2333_v41 = vor.u32 %v2767_v32, %v2332_v30 }
  0x27   :  { %v2229_v45 = vor.u32 %v2742_v39, %v2228_v37  ;;  %v1940_v47 = vld [vmem:[#allocation5 + $0xc0] sm:$0xf]  ;;  %v2233_v50 = vor.u32 %v2738_v42, %v2230_v43  ;;  %v2666_v52 = vld [vmem:[#allocation5 + $0xc4] sm:$0xf]  ;;  %898 = vmatpush.bf16.msra.mxu0 %v1973_v44  ;;  %924 = vmatpush.bf16.msra.mxu2 %v1977_v46  ;;  %v2763_v37 = vld [vmem:[#allocation5 + $0x3cc] sm:$0xf]  ;;  %v2081_v42 = vor.u32 %v2699_v33, %v2078_v34 }
  0x28   :  { %v2670_v48 = vld [vmem:[#allocation5 + $0xdc] sm:$0xf0]  ;;  %v1942_v53 = vld [vmem:[#allocation5 + $0xe0] sm:$0xf0]  ;;  %v2334_v38 = vld [vmem:[#allocation5 + $0x3e8] sm:$0xf0] }
  0x29   :  { %v2196_v49 = vld [vmem:[#allocation5 + $0x2c0] sm:$0xf]  ;;  %v2730_v54 = vld [vmem:[#allocation5 + $0x2c4] sm:$0xf]  ;;  %v1941_v56 = vor.u32 %v2670_v48, %v1940_v47  ;;  %911 = vmatpush.bf16.msra.mxu1 %v2229_v45  ;;  %v1945_v58 = vor.u32 %v2666_v52, %v1942_v53  ;;  %937 = vmatpush.bf16.msra.mxu3 %v2233_v50  ;;  %v2044_v43 = vld [vmem:[#allocation5 + $0x188] sm:$0xf]  ;;  %v2337_v46 = vor.u32 %v2763_v37, %v2334_v38 }
  0x2a   :  { %v2734_v51 = vld [vmem:[#allocation5 + $0x2dc] sm:$0xf0]  ;;  %v2198_v55 = vld [vmem:[#allocation5 + $0x2e0] sm:$0xf0]  ;;  %v2695_v44 = vld [vmem:[#allocation5 + $0x1a4] sm:$0xf0] }
  0x2b   :  { %v2197_v57 = vor.u32 %v2734_v51, %v2196_v49  ;;  %v1908_v59 = vld [vmem:[#allocation5 + $0x80] sm:$0xf]  ;;  %v2201_v62 = vor.u32 %v2730_v54, %v2198_v55  ;;  %v2658_v0 = vld [vmem:[#allocation5 + $0x84] sm:$0xf]  ;;  %899 = vmatpush.bf16.msra.mxu0 %v1941_v56  ;;  %925 = vmatpush.bf16.msra.mxu2 %v1945_v58  ;;  %v2300_v45 = vld [vmem:[#allocation5 + $0x388] sm:$0xf]  ;;  %v2045_v53 = vor.u32 %v2695_v44, %v2044_v43 }
  0x2c   :  { %v2662_v60 = vld [vmem:[#allocation5 + $0x9c] sm:$0xf0]  ;;  %v1910_v1 = vld [vmem:[#allocation5 + $0xa0] sm:$0xf0]  ;;  %v2759_v47 = vld [vmem:[#allocation5 + $0x3a4] sm:$0xf0] }
  0x2d   :  { %v2164_v61 = vld [vmem:[#allocation5 + $0x280] sm:$0xf]  ;;  %v2722_v2 = vld [vmem:[#allocation5 + $0x284] sm:$0xf]  ;;  %v1909_v4 = vor.u32 %v2662_v60, %v1908_v59  ;;  %912 = vmatpush.bf16.msra.mxu1 %v2197_v57  ;;  %v1913_v6 = vor.u32 %v2658_v0, %v1910_v1  ;;  %938 = vmatpush.bf16.msra.mxu3 %v2201_v62  ;;  %v2691_v48 = vld [vmem:[#allocation5 + $0x18c] sm:$0xf]  ;;  %v2301_v56 = vor.u32 %v2759_v47, %v2300_v45 }
  0x2e   :  { %v2726_v63 = vld [vmem:[#allocation5 + $0x29c] sm:$0xf0]  ;;  %v2166_v3 = vld [vmem:[#allocation5 + $0x2a0] sm:$0xf0]  ;;  %v2046_v49 = vld [vmem:[#allocation5 + $0x1a8] sm:$0xf0] }
  0x2f   :  { %v2165_v5 = vor.u32 %v2726_v63, %v2164_v61  ;;  %v1876_v7 = vld [vmem:[#allocation5 + $0x40] sm:$0xf]  ;;  %v2169_v10 = vor.u32 %v2722_v2, %v2166_v3  ;;  %v2650_v12 = vld [vmem:[#allocation5 + $0x44] sm:$0xf]  ;;  %900 = vmatpush.bf16.msra.mxu0 %v1909_v4  ;;  %926 = vmatpush.bf16.msra.mxu2 %v1913_v6  ;;  %v2755_v50 = vld [vmem:[#allocation5 + $0x38c] sm:$0xf]  ;;  %v2049_v57 = vor.u32 %v2691_v48, %v2046_v49 }
  0x30   :  { %v2654_v8 = vld [vmem:[#allocation5 + $0x5c] sm:$0xf0]  ;;  %v1878_v13 = vld [vmem:[#allocation5 + $0x60] sm:$0xf0]  ;;  %v2302_v51 = vld [vmem:[#allocation5 + $0x3a8] sm:$0xf0] }
  0x31   :  { %v2132_v9 = vld [vmem:[#allocation5 + $0x240] sm:$0xf]  ;;  %v2714_v14 = vld [vmem:[#allocation5 + $0x244] sm:$0xf]  ;;  %v1877_v16 = vor.u32 %v2654_v8, %v1876_v7  ;;  %913 = vmatpush.bf16.msra.mxu1 %v2165_v5  ;;  %v1881_v20 = vor.u32 %v2650_v12, %v1878_v13  ;;  %939 = vmatpush.bf16.msra.mxu3 %v2169_v10  ;;  %v101_v52 = vld [vmem:[#allocation2] sm:$0xff]  ;;  %v2305_v61 = vor.u32 %v2755_v50, %v2302_v51 }
  0x32   :  { %v2718_v11 = vld [vmem:[#allocation5 + $0x25c] sm:$0xf0]  ;;  %v2134_v15 = vld [vmem:[#allocation5 + $0x260] sm:$0xf0]  ;;  %v249_v54 = vunpack.c.l.b16 %v101_v52  ;;  %v250_v55 = vunpack.c.h.b16 %v101_v52  ;;  %v2012_v58 = vld [vmem:[#allocation5 + $0x148] sm:$0xf] }
  0x33   :  { %v1844_v17 = vld [vmem:[#allocation5] sm:$0xf]  ;;  %v2133_v19 = vor.u32 %v2718_v11, %v2132_v9  ;;  %v2642_v23 = vld [vmem:[#allocation5 + $0x4] sm:$0xf]  ;;  %v2137_v24 = vor.u32 %v2714_v14, %v2134_v15  ;;  %901 = vmatpush.bf16.msra.mxu0 %v1877_v16  ;;  %927 = vmatpush.bf16.msra.mxu2 %v1881_v20  ;;  %v2687_v59 = vld [vmem:[#allocation5 + $0x164] sm:$0xf0] }
  0x34   :  { %v2646_v18 = vld [vmem:[#allocation5 + $0x1c] sm:$0xf0]  ;;  %v1846_v25 = vld [vmem:[#allocation5 + $0x20] sm:$0xf0]  ;;  %v2268_v60 = vld [vmem:[#allocation5 + $0x348] sm:$0xf]  ;;  %v3071_v1 = vpack.c.b16 %v249_v54, %v249_v54  ;;  %v3073_v4 = vpack.c.b16 %v250_v55, %v250_v55  ;;  %v2013_v5 = vor.u32 %v2687_v59, %v2012_v58 }
  0x35   :  { %v2100_v21 = vld [vmem:[#allocation5 + $0x200] sm:$0xf]  ;;  %v2706_v26 = vld [vmem:[#allocation5 + $0x204] sm:$0xf]  ;;  %v1845_v31 = vor.u32 %v2646_v18, %v1844_v17  ;;  %914 = vmatpush.bf16.msra.mxu1 %v2133_v19  ;;  %v1849_v36 = vor.u32 %v2642_v23, %v1846_v25  ;;  %940 = vmatpush.bf16.msra.mxu3 %v2137_v24  ;;  %v2751_v62 = vld [vmem:[#allocation5 + $0x364] sm:$0xf0] }
  0x36   :  { %v2710_v22 = vld [vmem:[#allocation5 + $0x21c] sm:$0xf0]  ;;  %v2102_v27 = vld [vmem:[#allocation5 + $0x220] sm:$0xf0]  ;;  %v2683_v63 = vld [vmem:[#allocation5 + $0x14c] sm:$0xf]  ;;  %v2269_v6 = vor.u32 %v2751_v62, %v2268_v60 }
  0x37   :  { %v2101_v35 = vor.u32 %v2710_v22, %v2100_v21  ;;  %v2105_v39 = vor.u32 %v2706_v26, %v2102_v27  ;;  %902 = vmatpush.bf16.msra.mxu0 %v1845_v31  ;;  %928 = vmatpush.bf16.msra.mxu2 %v1849_v36  ;;  %v2014_v0 = vld [vmem:[#allocation5 + $0x168] sm:$0xf0]  ;;  %v1980_v8 = vld [vmem:[#allocation5 + $0x108] sm:$0xf] }
  0x38   :  { %v2747_v2 = vld [vmem:[#allocation5 + $0x34c] sm:$0xf]  ;;  %v2017_v7 = vor.u32 %v2683_v63, %v2014_v0  ;;  %v2679_v9 = vld [vmem:[#allocation5 + $0x124] sm:$0xf0] }
  0x39   :  { %915 = vmatpush.bf16.msra.mxu1 %v2101_v35  ;;  %941 = vmatpush.bf16.msra.mxu3 %v2105_v39  ;;  %v2270_v3 = vld [vmem:[#allocation5 + $0x368] sm:$0xf0]  ;;  %v2236_v10 = vld [vmem:[#allocation5 + $0x308] sm:$0xf]  ;;  %v1981_v17 = vor.u32 %v2679_v9, %v1980_v8  ;;  %v2700_v8 = vld [vmem:[#allocation5 + $0x1d4] sm:$0xf] }
  0x3a   :  { %929 = vmatmul.bf16.vlgmr.msra.gmra.mxu2 %v3071_v1  ;;  %v2273_v11 = vor.u32 %v2747_v2, %v2270_v3  ;;  %v2743_v12 = vld [vmem:[#allocation5 + $0x324] sm:$0xf0]  ;;  %v2675_v13 = vld [vmem:[#allocation5 + $0x10c] sm:$0xf]  ;;  %903 = vmatmul.bf16.vlgmr.msra.gmra.mxu0 %v3071_v1  ;;  %v2084_v2 = vld [vmem:[#allocation5 + $0x1d0] sm:$0xf] }
  0x3b   :  { %947 = vmatpush.bf16.msrb.mxu0 %v2077_v40  ;;  %973 = vmatpush.bf16.msrb.mxu2 %v2081_v42  ;;  %v1982_v14 = vld [vmem:[#allocation5 + $0x128] sm:$0xf0]  ;;  %v2237_v18 = vor.u32 %v2743_v12, %v2236_v10  ;;  %v1948_v20 = vld [vmem:[#allocation5 + $0xc8] sm:$0xf]  ;;  %v2704_v3 = vld [vmem:[#allocation5 + $0x1ec] sm:$0xf0] }
  0x3c   :  { %v2739_v15 = vld [vmem:[#allocation5 + $0x30c] sm:$0xf]  ;;  %916 = vmatmul.bf16.vlgmr.msra.gmra.mxu1 %v3073_v4  ;;  %942 = vmatmul.bf16.vlgmr.msra.gmra.mxu3 %v3073_v4  ;;  %v1985_v19 = vor.u32 %v2675_v13, %v1982_v14  ;;  %v2671_v21 = vld [vmem:[#allocation5 + $0xe4] sm:$0xf0]  ;;  %v2086_v9 = vld [vmem:[#allocation5 + $0x1f0] sm:$0xf0] }
  0x3d   :  { %960 = vmatpush.bf16.msrb.mxu1 %v2333_v41  ;;  %986 = vmatpush.bf16.msrb.mxu3 %v2337_v46  ;;  %v2238_v16 = vld [vmem:[#allocation5 + $0x328] sm:$0xf0]  ;;  %v2204_v22 = vld [vmem:[#allocation5 + $0x2c8] sm:$0xf]  ;;  %v1949_v29 = vor.u32 %v2671_v21, %v1948_v20  ;;  %v2764_v12 = vld [vmem:[#allocation5 + $0x3d4] sm:$0xf] }
  0x3e   :  { %v2241_v23 = vor.u32 %v2739_v15, %v2238_v16  ;;  %v2735_v24 = vld [vmem:[#allocation5 + $0x2e4] sm:$0xf0]  ;;  %v2667_v25 = vld [vmem:[#allocation5 + $0xcc] sm:$0xf]  ;;  %v2342_v13 = vld [vmem:[#allocation5 + $0x3f0] sm:$0xf0]  ;;  %v2085_v15 = vor.u32 %v2704_v3, %v2084_v2 }
  0x3f   :  { %948 = vmatpush.bf16.msrb.mxu0 %v2045_v53  ;;  %974 = vmatpush.bf16.msrb.mxu2 %v2049_v57  ;;  %v1950_v26 = vld [vmem:[#allocation5 + $0xe8] sm:$0xf0]  ;;  %v2205_v30 = vor.u32 %v2735_v24, %v2204_v22  ;;  %v1916_v32 = vld [vmem:[#allocation5 + $0x88] sm:$0xf]  ;;  %v2308_v20 = vld [vmem:[#allocation5 + $0x390] sm:$0xf]  ;;  %v2345_v21 = vor.u32 %v2764_v12, %v2342_v13 }
  0x40   :  { %v2731_v27 = vld [vmem:[#allocation5 + $0x2cc] sm:$0xf]  ;;  %v1953_v31 = vor.u32 %v2667_v25, %v1950_v26  ;;  %v2663_v33 = vld [vmem:[#allocation5 + $0xa4] sm:$0xf0]  ;;  %v2760_v22 = vld [vmem:[#allocation5 + $0x3ac] sm:$0xf0] }
  0x41   :  { %961 = vmatpush.bf16.msrb.mxu1 %v2301_v56  ;;  %987 = vmatpush.bf16.msrb.mxu3 %v2305_v61  ;;  %v2206_v28 = vld [vmem:[#allocation5 + $0x2e8] sm:$0xf0]  ;;  %v2172_v34 = vld [vmem:[#allocation5 + $0x288] sm:$0xf]  ;;  %v1917_v41 = vor.u32 %v2663_v33, %v1916_v32  ;;  %v2054_v24 = vld [vmem:[#allocation5 + $0x1b0] sm:$0xf0] }
  0x42   :  { %v2209_v35 = vor.u32 %v2731_v27, %v2206_v28  ;;  %v2727_v36 = vld [vmem:[#allocation5 + $0x2a4] sm:$0xf0]  ;;  %v2659_v37 = vld [vmem:[#allocation5 + $0x8c] sm:$0xf]  ;;  %v2756_v25 = vld [vmem:[#allocation5 + $0x394] sm:$0xf]  ;;  %v2309_v28 = vor.u32 %v2760_v22, %v2308_v20 }
  0x43   :  { %949 = vmatpush.bf16.msrb.mxu0 %v2013_v5  ;;  %975 = vmatpush.bf16.msrb.mxu2 %v2017_v7  ;;  %v1918_v38 = vld [vmem:[#allocation5 + $0xa8] sm:$0xf0]  ;;  %v2173_v42 = vor.u32 %v2727_v36, %v2172_v34  ;;  %v1884_v44 = vld [vmem:[#allocation5 + $0x48] sm:$0xf]  ;;  %v2340_v5 = vld [vmem:[#allocation5 + $0x3d0] sm:$0xf] }
  0x44   :  { %v2723_v39 = vld [vmem:[#allocation5 + $0x28c] sm:$0xf]  ;;  %v1921_v43 = vor.u32 %v2659_v37, %v1918_v38  ;;  %v2655_v45 = vld [vmem:[#allocation5 + $0x64] sm:$0xf0]  ;;  %v2768_v7 = vld [vmem:[#allocation5 + $0x3ec] sm:$0xf0] }
  0x45   :  { %962 = vmatpush.bf16.msrb.mxu1 %v2269_v6  ;;  %988 = vmatpush.bf16.msrb.mxu3 %v2273_v11  ;;  %v2174_v40 = vld [vmem:[#allocation5 + $0x2a8] sm:$0xf0]  ;;  %v2140_v46 = vld [vmem:[#allocation5 + $0x248] sm:$0xf]  ;;  %v1885_v53 = vor.u32 %v2655_v45, %v1884_v44  ;;  %v2341_v16 = vor.u32 %v2768_v7, %v2340_v5  ;;  %v2310_v26 = vld [vmem:[#allocation5 + $0x3b0] sm:$0xf0] }
  0x46   :  { %v2177_v47 = vor.u32 %v2723_v39, %v2174_v40  ;;  %v2719_v48 = vld [vmem:[#allocation5 + $0x264] sm:$0xf0]  ;;  %v2651_v49 = vld [vmem:[#allocation5 + $0x4c] sm:$0xf]  ;;  %v2276_v32 = vld [vmem:[#allocation5 + $0x350] sm:$0xf]  ;;  %v2313_v33 = vor.u32 %v2756_v25, %v2310_v26 }
  0x47   :  { %950 = vmatpush.bf16.msrb.mxu0 %v1981_v17  ;;  %976 = vmatpush.bf16.msrb.mxu2 %v1985_v19  ;;  %v1886_v50 = vld [vmem:[#allocation5 + $0x68] sm:$0xf0]  ;;  %v1852_v54 = vld [vmem:[#allocation5 + $0x8] sm:$0xf]  ;;  %v2141_v56 = vor.u32 %v2719_v48, %v2140_v46  ;;  %v2089_v17 = vor.u32 %v2700_v8, %v2086_v9  ;;  %v2696_v19 = vld [vmem:[#allocation5 + $0x1ac] sm:$0xf0] }
  0x48   :  { %v2715_v51 = vld [vmem:[#allocation5 + $0x24c] sm:$0xf]  ;;  %v2647_v55 = vld [vmem:[#allocation5 + $0x24] sm:$0xf0]  ;;  %v1889_v57 = vor.u32 %v2651_v49, %v1886_v50  ;;  %v2752_v34 = vld [vmem:[#allocation5 + $0x36c] sm:$0xf0] }
  0x49   :  { %963 = vmatpush.bf16.msrb.mxu1 %v2237_v18  ;;  %989 = vmatpush.bf16.msrb.mxu3 %v2241_v23  ;;  %v2142_v52 = vld [vmem:[#allocation5 + $0x268] sm:$0xf0]  ;;  %v2108_v58 = vld [vmem:[#allocation5 + $0x208] sm:$0xf]  ;;  %v1853_v6 = vor.u32 %v2647_v55, %v1852_v54  ;;  %v2052_v18 = vld [vmem:[#allocation5 + $0x190] sm:$0xf]  ;;  %v2277_v40 = vor.u32 %v2752_v34, %v2276_v32 }
  0x4a   :  { %v2711_v59 = vld [vmem:[#allocation5 + $0x224] sm:$0xf0]  ;;  %v2643_v60 = vld [vmem:[#allocation5 + $0xc] sm:$0xf]  ;;  %v2145_v61 = vor.u32 %v2715_v51, %v2142_v52  ;;  %v2692_v23 = vld [vmem:[#allocation5 + $0x194] sm:$0xf]  ;;  %v2053_v27 = vor.u32 %v2696_v19, %v2052_v18 }
  0x4b   :  { %951 = vmatpush.bf16.msrb.mxu0 %v1949_v29  ;;  %977 = vmatpush.bf16.msrb.mxu2 %v1953_v31  ;;  %v1854_v62 = vld [vmem:[#allocation5 + $0x28] sm:$0xf0]  ;;  %v2109_v10 = vor.u32 %v2711_v59, %v2108_v58  ;;  %v2057_v29 = vor.u32 %v2692_v23, %v2054_v24  ;;  %v2688_v31 = vld [vmem:[#allocation5 + $0x16c] sm:$0xf0]  ;;  %v2022_v36 = vld [vmem:[#allocation5 + $0x170] sm:$0xf0] }
  0x4c   :  { %v2707_v63 = vld [vmem:[#allocation5 + $0x20c] sm:$0xf]  ;;  %v1857_v11 = vor.u32 %v2643_v60, %v1854_v62  ;;  %v2748_v37 = vld [vmem:[#allocation5 + $0x354] sm:$0xf]  ;;  %v2244_v44 = vld [vmem:[#allocation5 + $0x310] sm:$0xf] }
  0x4d   :  { %964 = vmatpush.bf16.msrb.mxu1 %v2205_v30  ;;  %990 = vmatpush.bf16.msrb.mxu3 %v2209_v35  ;;  %v2110_v0 = vld [vmem:[#allocation5 + $0x228] sm:$0xf0]  ;;  %v2020_v30 = vld [vmem:[#allocation5 + $0x150] sm:$0xf]  ;;  %v2684_v35 = vld [vmem:[#allocation5 + $0x154] sm:$0xf] }
  0x4e   :  { %v2113_v14 = vor.u32 %v2707_v63, %v2110_v0  ;;  %v2278_v38 = vld [vmem:[#allocation5 + $0x370] sm:$0xf0]  ;;  %v2021_v39 = vor.u32 %v2688_v31, %v2020_v30  ;;  %v2744_v46 = vld [vmem:[#allocation5 + $0x32c] sm:$0xf0] }
  0x4f   :  { %952 = vmatpush.bf16.msrb.mxu0 %v1917_v41  ;;  %978 = vmatpush.bf16.msrb.mxu2 %v1921_v43  ;;  %v2025_v41 = vor.u32 %v2684_v35, %v2022_v36  ;;  %v2680_v43 = vld [vmem:[#allocation5 + $0x12c] sm:$0xf0]  ;;  %v2281_v45 = vor.u32 %v2748_v37, %v2278_v38  ;;  %v1990_v48 = vld [vmem:[#allocation5 + $0x130] sm:$0xf0]  ;;  %v2245_v52 = vor.u32 %v2744_v46, %v2244_v44  ;;  %v2092_v37 = vld [vmem:[#allocation5 + $0x1d8] sm:$0xf] }
  0x50   :  { %v2740_v49 = vld [vmem:[#allocation5 + $0x314] sm:$0xf]  ;;  %v1956_v54 = vld [vmem:[#allocation5 + $0xd0] sm:$0xf]  ;;  %v2705_v38 = vld [vmem:[#allocation5 + $0x1f4] sm:$0xf0] }
  0x51   :  { %965 = vmatpush.bf16.msrb.mxu1 %v2173_v42  ;;  %991 = vmatpush.bf16.msrb.mxu3 %v2177_v47  ;;  %v1988_v42 = vld [vmem:[#allocation5 + $0x110] sm:$0xf]  ;;  %v2676_v47 = vld [vmem:[#allocation5 + $0x114] sm:$0xf]  ;;  %v2765_v46 = vld [vmem:[#allocation5 + $0x3dc] sm:$0xf] }
  0x52   :  { %v2246_v50 = vld [vmem:[#allocation5 + $0x330] sm:$0xf0]  ;;  %v1989_v51 = vor.u32 %v2680_v43, %v1988_v42  ;;  %v2672_v55 = vld [vmem:[#allocation5 + $0xec] sm:$0xf0]  ;;  %v2701_v42 = vld [vmem:[#allocation5 + $0x1dc] sm:$0xf] }
  0x53   :  { %953 = vmatpush.bf16.msrb.mxu0 %v1885_v53  ;;  %979 = vmatpush.bf16.msrb.mxu2 %v1889_v57  ;;  %v1993_v53 = vor.u32 %v2676_v47, %v1990_v48  ;;  %v2249_v57 = vor.u32 %v2740_v49, %v2246_v50  ;;  %v2736_v58 = vld [vmem:[#allocation5 + $0x2ec] sm:$0xf0]  ;;  %v2668_v59 = vld [vmem:[#allocation5 + $0xd4] sm:$0xf]  ;;  %v1957_v63 = vor.u32 %v2672_v55, %v1956_v54  ;;  %v2094_v43 = vld [vmem:[#allocation5 + $0x1f8] sm:$0xf0] }
  0x54   :  { %v1958_v60 = vld [vmem:[#allocation5 + $0xf0] sm:$0xf0]  ;;  %v1924_v3 = vld [vmem:[#allocation5 + $0x90] sm:$0xf]  ;;  %v2350_v47 = vld [vmem:[#allocation5 + $0x3f8] sm:$0xf0]  ;;  %v2093_v49 = vor.u32 %v2705_v38, %v2092_v37 }
  0x55   :  { %966 = vmatpush.bf16.msrb.mxu1 %v2141_v56  ;;  %992 = vmatpush.bf16.msrb.mxu3 %v2145_v61  ;;  %v2212_v56 = vld [vmem:[#allocation5 + $0x2d0] sm:$0xf]  ;;  %v2732_v61 = vld [vmem:[#allocation5 + $0x2d4] sm:$0xf]  ;;  %v1961_v2 = vor.u32 %v2668_v59, %v1958_v60  ;;  %v2316_v54 = vld [vmem:[#allocation5 + $0x398] sm:$0xf]  ;;  %v2353_v55 = vor.u32 %v2765_v46, %v2350_v47 }
  0x56   :  { %v2214_v62 = vld [vmem:[#allocation5 + $0x2f0] sm:$0xf0]  ;;  %v2213_v0 = vor.u32 %v2736_v58, %v2212_v56  ;;  %v2664_v5 = vld [vmem:[#allocation5 + $0xac] sm:$0xf0]  ;;  %v2761_v56 = vld [vmem:[#allocation5 + $0x3b4] sm:$0xf0] }
  0x57   :  { %954 = vmatpush.bf16.msrb.mxu0 %v1853_v6  ;;  %980 = vmatpush.bf16.msrb.mxu2 %v1857_v11  ;;  %v2180_v6 = vld [vmem:[#allocation5 + $0x290] sm:$0xf]  ;;  %v2217_v7 = vor.u32 %v2732_v61, %v2214_v62  ;;  %v2660_v9 = vld [vmem:[#allocation5 + $0x94] sm:$0xf]  ;;  %v1925_v13 = vor.u32 %v2664_v5, %v1924_v3  ;;  %v2062_v58 = vld [vmem:[#allocation5 + $0x1b8] sm:$0xf0]  ;;  %v2317_v62 = vor.u32 %v2761_v56, %v2316_v54 }
  0x58   :  { %v2728_v8 = vld [vmem:[#allocation5 + $0x2ac] sm:$0xf0]  ;;  %v2724_v11 = vld [vmem:[#allocation5 + $0x294] sm:$0xf]  ;;  %v2757_v59 = vld [vmem:[#allocation5 + $0x39c] sm:$0xf] }
  0x59   :  { %967 = vmatpush.bf16.msrb.mxu1 %v2109_v10  ;;  %993 = vmatpush.bf16.msrb.mxu3 %v2113_v14  ;;  %v1926_v10 = vld [vmem:[#allocation5 + $0xb0] sm:$0xf0]  ;;  %v2181_v14 = vor.u32 %v2728_v8, %v2180_v6  ;;  %v2148_v18 = vld [vmem:[#allocation5 + $0x250] sm:$0xf]  ;;  %v2318_v60 = vld [vmem:[#allocation5 + $0x3b8] sm:$0xf0] }
  0x5a   :  { %955 = vmatmul.bf16.vlgmr.msrb.gmra.mxu0 %v3071_v1  ;;  %981 = vmatmul.bf16.vlgmr.msrb.gmra.mxu2 %v3071_v1  ;;  %v2182_v12 = vld [vmem:[#allocation5 + $0x2b0] sm:$0xf0]  ;;  %v2720_v20 = vld [vmem:[#allocation5 + $0x26c] sm:$0xf0]  ;;  %v2284_v3 = vld [vmem:[#allocation5 + $0x358] sm:$0xf]  ;;  %v2321_v5 = vor.u32 %v2757_v59, %v2318_v60 }
  0x5b   :  { %999 = vmatpush.bf16.msra.mxu0 %v2085_v15  ;;  %1025 = vmatpush.bf16.msra.mxu2 %v2089_v17  ;;  %v1929_v15 = vor.u32 %v2660_v9, %v1926_v10  ;;  %v2656_v17 = vld [vmem:[#allocation5 + $0x6c] sm:$0xf0]  ;;  %v2185_v19 = vor.u32 %v2724_v11, %v2182_v12  ;;  %v1894_v22 = vld [vmem:[#allocation5 + $0x70] sm:$0xf0]  ;;  %v2753_v6 = vld [vmem:[#allocation5 + $0x374] sm:$0xf0] }
  0x5c   :  { %968 = vmatmul.bf16.vlgmr.msrb.gmra.mxu1 %v3073_v4  ;;  %994 = vmatmul.bf16.vlgmr.msrb.gmra.mxu3 %v3073_v4  ;;  %v2716_v23 = vld [vmem:[#allocation5 + $0x254] sm:$0xf]  ;;  %v1860_v26 = vld [vmem:[#allocation5 + $0x10] sm:$0xf]  ;;  %v2030_v8 = vld [vmem:[#allocation5 + $0x178] sm:$0xf0]  ;;  %v2285_v12 = vor.u32 %v2753_v6, %v2284_v3 }
  0x5d   :  { %1012 = vmatpush.bf16.msra.mxu1 %v2341_v16  ;;  %1038 = vmatpush.bf16.msra.mxu3 %v2345_v21  ;;  %v1892_v16 = vld [vmem:[#allocation5 + $0x50] sm:$0xf]  ;;  %v2652_v21 = vld [vmem:[#allocation5 + $0x54] sm:$0xf]  ;;  %v2749_v9 = vld [vmem:[#allocation5 + $0x35c] sm:$0xf] }
  0x5e   :  { %v2150_v24 = vld [vmem:[#allocation5 + $0x270] sm:$0xf0]  ;;  %v1893_v25 = vor.u32 %v2656_v17, %v1892_v16  ;;  %v2116_v30 = vld [vmem:[#allocation5 + $0x210] sm:$0xf]  ;;  %v2286_v10 = vld [vmem:[#allocation5 + $0x378] sm:$0xf0] }
  0x5f   :  { %1000 = vmatpush.bf16.msra.mxu0 %v2053_v27  ;;  %1026 = vmatpush.bf16.msra.mxu2 %v2057_v29  ;;  %v2648_v27 = vld [vmem:[#allocation5 + $0x2c] sm:$0xf0]  ;;  %v1897_v29 = vor.u32 %v2652_v21, %v1894_v22  ;;  %v2644_v32 = vld [vmem:[#allocation5 + $0x14] sm:$0xf]  ;;  %v2252_v16 = vld [vmem:[#allocation5 + $0x318] sm:$0xf]  ;;  %v2289_v17 = vor.u32 %v2749_v9, %v2286_v10 }
  0x60   :  { %v2712_v31 = vld [vmem:[#allocation5 + $0x22c] sm:$0xf0]  ;;  %v1862_v34 = vld [vmem:[#allocation5 + $0x30] sm:$0xf0]  ;;  %v2741_v21 = vld [vmem:[#allocation5 + $0x31c] sm:$0xf] }
  0x61   :  { %1013 = vmatpush.bf16.msra.mxu1 %v2309_v28  ;;  %1039 = vmatpush.bf16.msra.mxu3 %v2313_v33  ;;  %v2149_v28 = vor.u32 %v2720_v20, %v2148_v18  ;;  %v2153_v33 = vor.u32 %v2716_v23, %v2150_v24  ;;  %v2708_v35 = vld [vmem:[#allocation5 + $0x214] sm:$0xf]  ;;  %v2117_v44 = vor.u32 %v2712_v31, %v2116_v30  ;;  %v2745_v18 = vld [vmem:[#allocation5 + $0x334] sm:$0xf0]  ;;  %v1998_v20 = vld [vmem:[#allocation5 + $0x138] sm:$0xf0] }
  0x62   :  { %v2118_v36 = vld [vmem:[#allocation5 + $0x230] sm:$0xf0]  ;;  %v2254_v22 = vld [vmem:[#allocation5 + $0x338] sm:$0xf0]  ;;  %v2253_v24 = vor.u32 %v2745_v18, %v2252_v16  ;;  %v2737_v30 = vld [vmem:[#allocation5 + $0x2f4] sm:$0xf0] }
  0x63   :  { %1001 = vmatpush.bf16.msra.mxu0 %v2021_v39  ;;  %1027 = vmatpush.bf16.msra.mxu2 %v2025_v41  ;;  %v2348_v39 = vld [vmem:[#allocation5 + $0x3d8] sm:$0xf]  ;;  %v2121_v48 = vor.u32 %v2708_v35, %v2118_v36  ;;  %v2669_v31 = vld [vmem:[#allocation5 + $0xdc] sm:$0xf] }
  0x64   :  { %v2769_v41 = vld [vmem:[#allocation5 + $0x3f4] sm:$0xf0]  ;;  %v2190_v46 = vld [vmem:[#allocation5 + $0x2b8] sm:$0xf0] }
  0x65   :  { %1014 = vmatpush.bf16.msra.mxu1 %v2277_v40  ;;  %1040 = vmatpush.bf16.msra.mxu3 %v2281_v45  ;;  %v1861_v40 = vor.u32 %v2648_v27, %v1860_v26  ;;  %v1865_v45 = vor.u32 %v2644_v32, %v1862_v34  ;;  %v2349_v50 = vor.u32 %v2769_v41, %v2348_v39  ;;  %v1964_v26 = vld [vmem:[#allocation5 + $0xd8] sm:$0xf]  ;;  %v1966_v32 = vld [vmem:[#allocation5 + $0xf8] sm:$0xf0] }
  0x66   :  { %v2673_v27 = vld [vmem:[#allocation5 + $0xf4] sm:$0xf0]  ;;  %v2222_v34 = vld [vmem:[#allocation5 + $0x2f8] sm:$0xf0]  ;;  %v1969_v37 = vor.u32 %v2669_v31, %v1966_v32  ;;  %v2771_v31 = vld [vmem:[#allocation8 + $0x8] sm:$0xff] }
  0x67   :  { %1002 = vmatpush.bf16.msra.mxu0 %v1989_v51  ;;  %1028 = vmatpush.bf16.msra.mxu2 %v1993_v53  ;;  %v2097_v51 = vor.u32 %v2701_v42, %v2094_v43  ;;  %v2697_v53 = vld [vmem:[#allocation5 + $0x1b4] sm:$0xf0]  ;;  %v1965_v35 = vor.u32 %v2673_v27, %v1964_v26  ;;  %v2661_v43 = vld [vmem:[#allocation5 + $0x9c] sm:$0xf]  ;;  %v2798_v32 = vld [vmem:[#allocation8 + $0xe0] sm:$0xff] }
  0x68   :  { %v1932_v38 = vld [vmem:[#allocation5 + $0x98] sm:$0xf]  ;;  %v1902_v56 = vld [vmem:[#allocation5 + $0x78] sm:$0xf0] }
  0x69   :  { %1015 = vmatpush.bf16.msra.mxu1 %v2245_v52  ;;  %1041 = vmatpush.bf16.msra.mxu3 %v2249_v57  ;;  %v2060_v52 = vld [vmem:[#allocation5 + $0x198] sm:$0xf]  ;;  %v2693_v57 = vld [vmem:[#allocation5 + $0x19c] sm:$0xf] }
  0x6a   :  { %v2061_v61 = vor.u32 %v2697_v53, %v2060_v52  ;;  %v2665_v39 = vld [vmem:[#allocation5 + $0xb4] sm:$0xf0]  ;;  %v1870_v6 = vld [vmem:[#allocation5 + $0x38] sm:$0xf0] }
  0x6b   :  { %1003 = vmatpush.bf16.msra.mxu0 %v1957_v63  ;;  %1029 = vmatpush.bf16.msra.mxu2 %v1961_v2  ;;  %v2065_v63 = vor.u32 %v2693_v57, %v2062_v58  ;;  %v2689_v2 = vld [vmem:[#allocation5 + $0x174] sm:$0xf0]  ;;  %v1933_v47 = vor.u32 %v2665_v39, %v1932_v38  ;;  %v2717_v57 = vld [vmem:[#allocation5 + $0x25c] sm:$0xf]  ;;  %v2778_v39 = vld [vmem:[#allocation8 + $0x40] sm:$0xff] }
  0x6c   :  { %v2729_v42 = vld [vmem:[#allocation5 + $0x2b4] sm:$0xf0]  ;;  %v2158_v58 = vld [vmem:[#allocation5 + $0x278] sm:$0xf0] }
  0x6d   :  { %1016 = vmatpush.bf16.msra.mxu1 %v2213_v0  ;;  %1042 = vmatpush.bf16.msra.mxu3 %v2217_v7  ;;  %v2028_v0 = vld [vmem:[#allocation5 + $0x158] sm:$0xf]  ;;  %v2685_v7 = vld [vmem:[#allocation5 + $0x15c] sm:$0xf] }
  0x6e   :  { %v2029_v11 = vor.u32 %v2689_v2, %v2028_v0  ;;  %v2156_v52 = vld [vmem:[#allocation5 + $0x258] sm:$0xf]  ;;  %v2161_v2 = vor.u32 %v2717_v57, %v2158_v58 }
  0x6f   :  { %1004 = vmatpush.bf16.msra.mxu0 %v1925_v13  ;;  %1030 = vmatpush.bf16.msra.mxu2 %v1929_v15  ;;  %v2033_v13 = vor.u32 %v2685_v7, %v2030_v8  ;;  %v2681_v15 = vld [vmem:[#allocation5 + $0x134] sm:$0xf0]  ;;  %v2709_v7 = vld [vmem:[#allocation5 + $0x21c] sm:$0xf] }
  0x70   :  { %v2721_v54 = vld [vmem:[#allocation5 + $0x274] sm:$0xf0]  ;;  %v2126_v8 = vld [vmem:[#allocation5 + $0x238] sm:$0xf0] }
  0x71   :  { %1017 = vmatpush.bf16.msra.mxu1 %v2181_v14  ;;  %1043 = vmatpush.bf16.msra.mxu3 %v2185_v19  ;;  %v1996_v14 = vld [vmem:[#allocation5 + $0x118] sm:$0xf]  ;;  %v2677_v19 = vld [vmem:[#allocation5 + $0x11c] sm:$0xf]  ;;  %v2157_v60 = vor.u32 %v2721_v54, %v2156_v52 }
  0x72   :  { %v1997_v23 = vor.u32 %v2681_v15, %v1996_v14  ;;  %v2124_v0 = vld [vmem:[#allocation5 + $0x218] sm:$0xf]  ;;  %v2785_v14 = vld [vmem:[#allocation8 + $0x78] sm:$0xff] }
  0x73   :  { %1005 = vmatpush.bf16.msra.mxu0 %v1893_v25  ;;  %1031 = vmatpush.bf16.msra.mxu2 %v1897_v29  ;;  %v2001_v25 = vor.u32 %v2677_v19, %v1998_v20  ;;  %v2257_v29 = vor.u32 %v2741_v21, %v2254_v22  ;;  %v2713_v3 = vld [vmem:[#allocation5 + $0x234] sm:$0xf0]  ;;  %v2793_v15 = vld [vmem:[#allocation8 + $0xb8] sm:$0xff]  ;;  %v2775_v19 = vld [vmem:[#allocation8 + $0x28] sm:$0xff] }
  0x74   :  { %v2125_v10 = vor.u32 %v2713_v3, %v2124_v0  ;;  %v2776_v16 = vld [vmem:[#allocation8 + $0x30] sm:$0xff]  ;;  %v2783_v20 = vld [vmem:[#allocation8 + $0x68] sm:$0xff]  ;;  %v2774_v21 = vld [vmem:[#allocation8 + $0x20] sm:$0xff] }
  0x75   :  { %1018 = vmatpush.bf16.msra.mxu1 %v2149_v28  ;;  %1044 = vmatpush.bf16.msra.mxu3 %v2153_v33  ;;  %v2220_v28 = vld [vmem:[#allocation5 + $0x2d8] sm:$0xf]  ;;  %v2733_v33 = vld [vmem:[#allocation5 + $0x2dc] sm:$0xf]  ;;  %v2801_v22 = vld [vmem:[#allocation8 + $0xf8] sm:$0xff] }
  0x76   :  { %v2221_v36 = vor.u32 %v2737_v30, %v2220_v28  ;;  %v2225_v41 = vor.u32 %v2733_v33, %v2222_v34  ;;  %v2792_v18 = vld [vmem:[#allocation8 + $0xb0] sm:$0xff]  ;;  %v2799_v28 = vld [vmem:[#allocation8 + $0xe8] sm:$0xff]  ;;  %v2789_v30 = vld [vmem:[#allocation8 + $0x98] sm:$0xff] }
  0x77   :  { %1006 = vmatpush.bf16.msra.mxu0 %v1861_v40  ;;  %1032 = vmatpush.bf16.msra.mxu2 %v1865_v45  ;;  %v2188_v40 = vld [vmem:[#allocation5 + $0x298] sm:$0xf]  ;;  %v2725_v45 = vld [vmem:[#allocation5 + $0x29c] sm:$0xf]  ;;  %v2779_v33 = vld [vmem:[#allocation8 + $0x48] sm:$0xff] }
  0x78   :  { %v2193_v53 = vor.u32 %v2725_v45, %v2190_v46  ;;  %v2800_v26 = vld [vmem:[#allocation8 + $0xf0] sm:$0xff]  ;;  %v2786_v46 = vld [vmem:[#allocation8 + $0x80] sm:$0xff] }
  0x79   :  { %1019 = vmatpush.bf16.msra.mxu1 %v2117_v44  ;;  %1045 = vmatpush.bf16.msra.mxu3 %v2121_v48  ;;  %v1934_v44 = vld [vmem:[#allocation5 + $0xb8] sm:$0xf0]  ;;  %v2189_v48 = vor.u32 %v2729_v42, %v2188_v40  ;;  %v2787_v40 = vld [vmem:[#allocation8 + $0x88] sm:$0xff]  ;;  %v2806_v3 = vld [vmem:[#allocation8 + $0x120] sm:$0xff] }
  0x7a   :  { %1007 = vmatmul.bf16.vlgmr.msra.gmra.mxu0 %v3071_v1  ;;  %1033 = vmatmul.bf16.vlgmr.msra.gmra.mxu2 %v3071_v1  ;;  %v2772_v27 = vld [vmem:[#allocation8 + $0x10] sm:$0xff] }
  0x7b   :  { %1051 = vmatpush.bf16.msrb.mxu0 %v2093_v49  ;;  %1077 = vmatpush.bf16.msrb.mxu2 %v2097_v51  ;;  %v1937_v49 = vor.u32 %v2661_v43, %v1934_v44  ;;  %v2657_v51 = vld [vmem:[#allocation5 + $0x74] sm:$0xf0] }
  0x7c   :  { %1020 = vmatmul.bf16.vlgmr.msra.gmra.mxu1 %v3073_v4  ;;  %1046 = vmatmul.bf16.vlgmr.msra.gmra.mxu3 %v3073_v4  ;;  %v2788_v34 = vld [vmem:[#allocation8 + $0x90] sm:$0xff] }
  0x7d   :  { %1064 = vmatpush.bf16.msrb.mxu1 %v2349_v50  ;;  %1090 = vmatpush.bf16.msrb.mxu3 %v2353_v55  ;;  %v1900_v50 = vld [vmem:[#allocation5 + $0x58] sm:$0xf]  ;;  %v2653_v55 = vld [vmem:[#allocation5 + $0x5c] sm:$0xf] }
  0x7e   :  { %v1901_v59 = vor.u32 %v2657_v51, %v1900_v50 }
  0x7f   :  { %1052 = vmatpush.bf16.msrb.mxu0 %v2061_v61  ;;  %1078 = vmatpush.bf16.msrb.mxu2 %v2065_v63  ;;  %v1905_v61 = vor.u32 %v2653_v55, %v1902_v56  ;;  %v2649_v63 = vld [vmem:[#allocation5 + $0x34] sm:$0xf0]  ;;  %v2794_v56 = vld [vmem:[#allocation8 + $0xc0] sm:$0xff] }
  0x81   :  { %1065 = vmatpush.bf16.msrb.mxu1 %v2317_v62  ;;  %1091 = vmatpush.bf16.msrb.mxu3 %v2321_v5  ;;  %v1868_v62 = vld [vmem:[#allocation5 + $0x18] sm:$0xf]  ;;  %v2645_v5 = vld [vmem:[#allocation5 + $0x1c] sm:$0xf] }
  0x82   :  { %v1869_v9 = vor.u32 %v2649_v63, %v1868_v62  ;;  %v2807_v62 = vld [vmem:[#allocation8 + $0x128] sm:$0xff]  ;;  %v2816_v63 = vld [vmem:[#allocation8 + $0x170] sm:$0xff] }
  0x83   :  { %1053 = vmatpush.bf16.msrb.mxu0 %v2029_v11  ;;  %1079 = vmatpush.bf16.msrb.mxu2 %v2033_v13  ;;  %v1873_v11 = vor.u32 %v2645_v5, %v1870_v6  ;;  %v2777_v13 = vld [vmem:[#allocation8 + $0x38] sm:$0xff]  ;;  %v2815_v6 = vld [vmem:[#allocation8 + $0x168] sm:$0xff] }
  0x85   :  { %1066 = vmatpush.bf16.msrb.mxu1 %v2285_v12  ;;  %1092 = vmatpush.bf16.msrb.mxu3 %v2289_v17  ;;  %v2129_v12 = vor.u32 %v2709_v7, %v2126_v8  ;;  %v2784_v17 = vld [vmem:[#allocation8 + $0x70] sm:$0xff]  ;;  %v2805_v7 = vld [vmem:[#allocation8 + $0x118] sm:$0xff]  ;;  %v2814_v8 = vld [vmem:[#allocation8 + $0x160] sm:$0xff] }
  0x87   :  { %1054 = vmatpush.bf16.msrb.mxu0 %v1997_v23  ;;  %1080 = vmatpush.bf16.msrb.mxu2 %v2001_v25  ;;  %v2782_v23 = vld [vmem:[#allocation8 + $0x60] sm:$0xff]  ;;  %v2773_v25 = vld [vmem:[#allocation8 + $0x18] sm:$0xff] }
  0x89   :  { %1067 = vmatpush.bf16.msrb.mxu1 %v2253_v24  ;;  %1093 = vmatpush.bf16.msrb.mxu3 %v2257_v29  ;;  %v2791_v24 = vld [vmem:[#allocation8 + $0xa8] sm:$0xff]  ;;  %v2780_v29 = vld [vmem:[#allocation8 + $0x50] sm:$0xff] }
  0x8b   :  { %1055 = vmatpush.bf16.msrb.mxu0 %v1965_v35  ;;  %1081 = vmatpush.bf16.msrb.mxu2 %v1969_v37  ;;  %v3091_v35 = vld [vmem:[#allocation7] sm:$0xff] }
  0x8c   :  { %v2797_v37 = vld [vmem:[#allocation8 + $0xd8] sm:$0xff]  ;;  %v232_v38 = vperm.slane %v3091_v35, 0  ;;  %v233_v45 = vperm.slane %v3091_v35, 1 }
  0x8d   :  { %1068 = vmatpush.bf16.msrb.mxu1 %v2221_v36  ;;  %1094 = vmatpush.bf16.msrb.mxu3 %v2225_v41  ;;  %v2770_v36 = vld [vmem:[#allocation8] sm:$0xff]  ;;  %v2796_v41 = vld [vmem:[#allocation8 + $0xd0] sm:$0xff] }
  0x8f   :  { %1056 = vmatpush.bf16.msrb.mxu0 %v1933_v47  ;;  %1082 = vmatpush.bf16.msrb.mxu2 %v1937_v49  ;;  %v2809_v47 = vld [vmem:[#allocation8 + $0x138] sm:$0xff]  ;;  %v2795_v49 = vld [vmem:[#allocation8 + $0xc8] sm:$0xff] }
  0x91   :  { %1069 = vmatpush.bf16.msrb.mxu1 %v2189_v48  ;;  %1095 = vmatpush.bf16.msrb.mxu3 %v2193_v53  ;;  %v2808_v53 = vld [vmem:[#allocation8 + $0x130] sm:$0xff] }
  0x93   :  { %1057 = vmatpush.bf16.msrb.mxu0 %v1901_v59  ;;  %1083 = vmatpush.bf16.msrb.mxu2 %v1905_v61  ;;  %v2817_v59 = vld [vmem:[#allocation8 + $0x178] sm:$0xff] }
  0x95   :  { %1070 = vmatpush.bf16.msrb.mxu1 %v2157_v60  ;;  %1096 = vmatpush.bf16.msrb.mxu3 %v2161_v2 }
  0x97   :  { %1058 = vmatpush.bf16.msrb.mxu0 %v1869_v9  ;;  %1084 = vmatpush.bf16.msrb.mxu2 %v1873_v11  ;;  %v2804_v9 = vld [vmem:[#allocation8 + $0x110] sm:$0xff]  ;;  %v2813_v11 = vld [vmem:[#allocation8 + $0x158] sm:$0xff] }
  0x99   :  { %1071 = vmatpush.bf16.msrb.mxu1 %v2125_v10  ;;  %1097 = vmatpush.bf16.msrb.mxu3 %v2129_v12  ;;  %v234_v10 = vperm.slane %v3091_v35, 2 }
  0x9a   :  { %1059 = vmatmul.bf16.vlgmr.msrb.gmra.mxu0 %v3071_v1  ;;  %1085 = vmatmul.bf16.vlgmr.msrb.gmra.mxu2 %v3071_v1  ;;  %v2781_v1 = vld [vmem:[#allocation8 + $0x58] sm:$0xff] }
  0x9b   :  { %1635 = vmatpush.bf16.msra.mxu0 %v2777_v13  ;;  %1661 = vmatpush.bf16.msra.mxu2 %v2793_v15  ;;  %v2803_v13 = vld [vmem:[#allocation8 + $0x108] sm:$0xff] }
  0x9c   :  { %1072 = vmatmul.bf16.vlgmr.msrb.gmra.mxu1 %v3073_v4  ;;  %1098 = vmatmul.bf16.vlgmr.msrb.gmra.mxu3 %v3073_v4  ;;  %v2790_v4 = vld [vmem:[#allocation8 + $0xa0] sm:$0xff] }
  0x9d   :  { %1648 = vmatpush.bf16.msra.mxu1 %v2785_v14  ;;  %1674 = vmatpush.bf16.msra.mxu3 %v2801_v22  ;;  %v2811_v22 = vld [vmem:[#allocation8 + $0x148] sm:$0xff] }
  0x9f   :  { %1636 = vmatpush.bf16.msra.mxu0 %v2776_v16  ;;  %1662 = vmatpush.bf16.msra.mxu2 %v2792_v18  ;;  %v2812_v16 = vld [vmem:[#allocation8 + $0x150] sm:$0xff]  ;;  %v235_v18 = vperm.slane %v3091_v35, 3 }
  0xa1   :  { %1649 = vmatpush.bf16.msra.mxu1 %v2784_v17  ;;  %1675 = vmatpush.bf16.msra.mxu3 %v2800_v26 }
  0xa3   :  { %1637 = vmatpush.bf16.msra.mxu0 %v2775_v19  ;;  %1663 = vmatpush.bf16.msra.mxu2 %v2791_v24  ;;  %v2802_v19 = vld [vmem:[#allocation8 + $0x100] sm:$0xff] }
  0xa5   :  { %1650 = vmatpush.bf16.msra.mxu1 %v2783_v20  ;;  %1676 = vmatpush.bf16.msra.mxu3 %v2799_v28 }
  0xa7   :  { %1638 = vmatpush.bf16.msra.mxu0 %v2774_v21  ;;  %1664 = vmatpush.bf16.msra.mxu2 %v2790_v4  ;;  %v2825_v21 = vld [vmem:[#allocation8 + $0x1b8] sm:$0xff] }
  0xa9   :  { %1651 = vmatpush.bf16.msra.mxu1 %v2782_v23  ;;  %1677 = vmatpush.bf16.msra.mxu3 %v2798_v32  ;;  %v2823_v32 = vld [vmem:[#allocation8 + $0x1a8] sm:$0xff] }
  0xab   :  { %1639 = vmatpush.bf16.msra.mxu0 %v2773_v25  ;;  %1665 = vmatpush.bf16.msra.mxu2 %v2789_v30  ;;  %v2833_v30 = vld [vmem:[#allocation8 + $0x1f8] sm:$0xff] }
  0xad   :  { %1652 = vmatpush.bf16.msra.mxu1 %v2781_v1  ;;  %1678 = vmatpush.bf16.msra.mxu3 %v2797_v37  ;;  %v2822_v37 = vld [vmem:[#allocation8 + $0x1a0] sm:$0xff] }
  0xaf   :  { %1640 = vmatpush.bf16.msra.mxu0 %v2772_v27  ;;  %1666 = vmatpush.bf16.msra.mxu2 %v2788_v34  ;;  %v2824_v27 = vld [vmem:[#allocation8 + $0x1b0] sm:$0xff] }
  0xb0   :  { %v2832_v34 = vld [vmem:[#allocation8 + $0x1f0] sm:$0xff] }
  0xb1   :  { %1653 = vmatpush.bf16.msra.mxu1 %v2780_v29  ;;  %1679 = vmatpush.bf16.msra.mxu3 %v2796_v41  ;;  %v2810_v29 = vld [vmem:[#allocation8 + $0x140] sm:$0xff] }
  0xb2   :  { %v2830_v41 = vld [vmem:[#allocation8 + $0x1e0] sm:$0xff] }
  0xb3   :  { %1641 = vmatpush.bf16.msra.mxu0 %v2771_v31  ;;  %1667 = vmatpush.bf16.msra.mxu2 %v2787_v40  ;;  %v2821_v40 = vld [vmem:[#allocation8 + $0x198] sm:$0xff] }
  0xb5   :  { %1654 = vmatpush.bf16.msra.mxu1 %v2779_v33  ;;  %1680 = vmatpush.bf16.msra.mxu3 %v2795_v49  ;;  %v2828_v49 = vld [vmem:[#allocation8 + $0x1d0] sm:$0xff] }
  0xb7   :  { %1642 = vmatpush.bf16.msra.mxu0 %v2770_v36  ;;  %v904_v42 = vpop.f32.mrf.mxu0  ;;  %1668 = vmatpush.bf16.msra.mxu2 %v2786_v46 }
  0xb8   :  { %v905_v43 = vadd.f32 %v904_v42, %v232_v38  ;;  %v2820_v42 = vld [vmem:[#allocation8 + $0x190] sm:$0xff] }
  0xb9   :  { %1655 = vmatpush.bf16.msra.mxu1 %v2778_v39  ;;  %v917_v44 = vpop.f32.mrf.mxu1  ;;  %1681 = vmatpush.bf16.msra.mxu3 %v2794_v56  ;;  %v2831_v39 = vld [vmem:[#allocation8 + $0x1e8] sm:$0xff] }
  0xba   :  { %v918_v48 = vadd.f32 %v917_v44, %v905_v43  ;;  %v236_v43 = vperm.slane %v3091_v35, 4  ;;  %v2829_v44 = vld [vmem:[#allocation8 + $0x1d8] sm:$0xff] }
  0xbb   :  { %1687 = vmatpush.bf16.msrb.mxu0 %v2809_v47  ;;  %1713 = vmatpush.bf16.msrb.mxu2 %v2825_v21 }
  0xbc   :  { %v1103_v51 = vmax.f32 %v918_v48, 0.0 }
  0xbd   :  { %v930_v50 = vpop.f32.mrf.mxu2  ;;  %1700 = vmatpush.bf16.msrb.mxu1 %v2817_v59  ;;  %1726 = vmatpush.bf16.msrb.mxu3 %v2833_v30  ;;  %v2840_v30 = vld [vmem:[#allocation10 + $0x30] sm:$0xff] }
  0xbe   :  { %v931_v52 = vadd.f32 %v930_v50, %v233_v45  ;;  %v1111_v54 = vpack.c.bf16 %v1103_v51, %v1103_v51  ;;  %v2819_v45 = vld [vmem:[#allocation8 + $0x188] sm:$0xff]  ;;  %v2818_v51 = vld [vmem:[#allocation8 + $0x180] sm:$0xff] }
  0xbf   :  { %v943_v55 = vpop.f32.mrf.mxu3  ;;  %v906_v57 = vpop.f32.mrf.mxu0  ;;  %1688 = vmatpush.bf16.msrb.mxu0 %v2808_v53  ;;  %1714 = vmatpush.bf16.msrb.mxu2 %v2824_v27 }
  0xc0   :  { %v944_v58 = vadd.f32 %v943_v55, %v931_v52  ;;  %1643 = vmatmul.bf16.vlgmr.msra.gmra.mxu0 %v1111_v54  ;;  %v237_v52 = vperm.slane %v3091_v35, 5  ;;  %v2827_v54 = vld [vmem:[#allocation8 + $0x1c8] sm:$0xff] }
  0xc1   :  { %v919_v60 = vpop.f32.mrf.mxu1  ;;  %1701 = vmatpush.bf16.msrb.mxu1 %v2816_v63  ;;  %1727 = vmatpush.bf16.msrb.mxu3 %v2832_v34 }
  0xc2   :  { %v1104_v61 = vmax.f32 %v944_v58, 0.0 }
  0xc3   :  { %1689 = vmatpush.bf16.msrb.mxu0 %v2807_v62  ;;  %1715 = vmatpush.bf16.msrb.mxu2 %v2823_v32  ;;  %v2839_v32 = vld [vmem:[#allocation10 + $0x28] sm:$0xff] }
  0xc4   :  { %v1112_v0 = vpack.c.bf16 %v1104_v61, %v1104_v61  ;;  %v2826_v61 = vld [vmem:[#allocation8 + $0x1c0] sm:$0xff] }
  0xc5   :  { %v932_v2 = vpop.f32.mrf.mxu2  ;;  %1702 = vmatpush.bf16.msrb.mxu1 %v2815_v6  ;;  %1728 = vmatpush.bf16.msrb.mxu3 %v2831_v39 }
  0xc6   :  { %1656 = vmatmul.bf16.vlgmr.msra.gmra.mxu1 %v1112_v0 }
  0xc7   :  { %v945_v5 = vpop.f32.mrf.mxu3  ;;  %1690 = vmatpush.bf16.msrb.mxu0 %v2806_v3  ;;  %1716 = vmatpush.bf16.msrb.mxu2 %v2822_v37 }
  0xc8   :  { %v238_v5 = vperm.slane %v3091_v35, 6 }
  0xc9   :  { %1703 = vmatpush.bf16.msrb.mxu1 %v2814_v8  ;;  %1729 = vmatpush.bf16.msrb.mxu3 %v2830_v41  ;;  %v2835_v41 = vld [vmem:[#allocation10 + $0x8] sm:$0xff] }
  0xcb   :  { %1691 = vmatpush.bf16.msrb.mxu0 %v2805_v7  ;;  %1717 = vmatpush.bf16.msrb.mxu2 %v2821_v40 }
  0xcd   :  { %1704 = vmatpush.bf16.msrb.mxu1 %v2813_v11  ;;  %1730 = vmatpush.bf16.msrb.mxu3 %v2829_v44 }
  0xcf   :  { %1692 = vmatpush.bf16.msrb.mxu0 %v2804_v9  ;;  %1718 = vmatpush.bf16.msrb.mxu2 %v2820_v42  ;;  %v2834_v42 = vld [vmem:[#allocation10] sm:$0xff] }
  0xd1   :  { %1705 = vmatpush.bf16.msrb.mxu1 %v2812_v16  ;;  %1731 = vmatpush.bf16.msrb.mxu3 %v2828_v49 }
  0xd3   :  { %1693 = vmatpush.bf16.msrb.mxu0 %v2803_v13  ;;  %1719 = vmatpush.bf16.msrb.mxu2 %v2819_v45 }
  0xd5   :  { %1706 = vmatpush.bf16.msrb.mxu1 %v2811_v22  ;;  %1732 = vmatpush.bf16.msrb.mxu3 %v2827_v54 }
  0xd7   :  { %v956_v12 = vpop.f32.mrf.mxu0  ;;  %1694 = vmatpush.bf16.msrb.mxu0 %v2802_v19  ;;  %1720 = vmatpush.bf16.msrb.mxu2 %v2818_v51 }
  0xd8   :  { %v957_v14 = vadd.f32 %v956_v12, %v234_v10  ;;  %v239_v10 = vperm.slane %v3091_v35, 7 }
  0xd9   :  { %v969_v15 = vpop.f32.mrf.mxu1  ;;  %1707 = vmatpush.bf16.msrb.mxu1 %v2810_v29  ;;  %1733 = vmatpush.bf16.msrb.mxu3 %v2826_v61 }
  0xda   :  { %v970_v17 = vadd.f32 %v969_v15, %v957_v14 }
  0xdc   :  { %v1105_v20 = vmax.f32 %v970_v17, 0.0 }
  0xdd   :  { %v982_v24 = vpop.f32.mrf.mxu2 }
  0xde   :  { %v1113_v23 = vpack.c.bf16 %v1105_v20, %v1105_v20  ;;  %v983_v25 = vadd.f32 %v982_v24, %v235_v18 }
  0xdf   :  { %v995_v26 = vpop.f32.mrf.mxu3  ;;  %v958_v1 = vpop.f32.mrf.mxu0 }
  0xe0   :  { %1669 = vmatmul.bf16.vlgmr.msra.gmra.mxu2 %v1113_v23  ;;  %v996_v28 = vadd.f32 %v995_v26, %v983_v25  ;;  %v2852_v23 = vld [vmem:[%s3114_s4] ss:$0 sm:$0xff] }
  0xe1   :  { %v971_v4 = vpop.f32.mrf.mxu1 }
  0xe2   :  { %v1106_v31 = vmax.f32 %v996_v28, 0.0  ;;  %v2841_v28 = vld [vmem:[#allocation10 + $0x38] sm:$0xff] }
  0xe3   :  { %1809 = vmatpush.bf16.msra.mxu0 %v2841_v28 }
  0xe4   :  { %v1114_v33 = vpack.c.bf16 %v1106_v31, %v1106_v31 }
  0xe5   :  { %v984_v36 = vpop.f32.mrf.mxu2 }
  0xe6   :  { %1682 = vmatmul.bf16.vlgmr.msra.gmra.mxu3 %v1114_v33  ;;  %v2838_v33 = vld [vmem:[#allocation10 + $0x20] sm:$0xff]  ;;  %v2837_v36 = vld [vmem:[#allocation10 + $0x18] sm:$0xff] }
  0xe7   :  { %v997_v38 = vpop.f32.mrf.mxu3  ;;  %1810 = vmatpush.bf16.msra.mxu0 %v2840_v30 }
  0xe8   :  { %v2836_v38 = vld [vmem:[#allocation10 + $0x10] sm:$0xff] }
  0xeb   :  { %1811 = vmatpush.bf16.msra.mxu0 %v2839_v32 }
  0xef   :  { %1812 = vmatpush.bf16.msra.mxu0 %v2838_v33 }
  0xf3   :  { %1813 = vmatpush.bf16.msra.mxu0 %v2837_v36 }
  0xf7   :  { %v1008_v46 = vpop.f32.mrf.mxu0  ;;  %1814 = vmatpush.bf16.msra.mxu0 %v2836_v38 }
  0xf8   :  { %v1009_v47 = vadd.f32 %v1008_v46, %v236_v43 }
  0xf9   :  { %v1021_v48 = vpop.f32.mrf.mxu1 }
  0xfa   :  { %v1022_v50 = vadd.f32 %v1021_v48, %v1009_v47 }
  0xfb   :  { %1815 = vmatpush.bf16.msra.mxu0 %v2835_v41 }
  0xfc   :  { %v1107_v53 = vmax.f32 %v1022_v50, 0.0 }
  0xfd   :  { %v1034_v56 = vpop.f32.mrf.mxu2 }
  0xfe   :  { %v1115_v55 = vpack.c.bf16 %v1107_v53, %v1107_v53  ;;  %v1035_v57 = vadd.f32 %v1034_v56, %v237_v52  ;;  %v2853_v56 = vld [vmem:[%s3116_s6] ss:$0 sm:$0xff] }
  0xff   :  { %v1047_v58 = vpop.f32.mrf.mxu3  ;;  %v1010_v59 = vpop.f32.mrf.mxu0  ;;  %1816 = vmatpush.bf16.msra.mxu0 %v2834_v42 }
 0x100   :  { %1695 = vmatmul.bf16.vlgmr.msrb.gmra.mxu0 %v1115_v55  ;;  %v1048_v62 = vadd.f32 %v1047_v58, %v1035_v57 }
 0x101   :  { %v1023_v60 = vpop.f32.mrf.mxu1 }
 0x102   :  { %v1108_v63 = vmax.f32 %v1048_v62, 0.0 }
 0x104   :  { %v1116_v0 = vpack.c.bf16 %v1108_v63, %v1108_v63 }
 0x105   :  { %v1036_v2 = vpop.f32.mrf.mxu2 }
 0x106   :  { %1708 = vmatmul.bf16.vlgmr.msrb.gmra.mxu1 %v1116_v0 }
 0x107   :  { %v1049_v3 = vpop.f32.mrf.mxu3 }
 0x117   :  { %v1060_v6 = vpop.f32.mrf.mxu0 }
 0x118   :  { %v1061_v7 = vadd.f32 %v1060_v6, %v238_v5 }
 0x119   :  { %v1073_v8 = vpop.f32.mrf.mxu1 }
 0x11a   :  { %v1074_v9 = vadd.f32 %v1073_v8, %v1061_v7 }
 0x11c   :  { %v1109_v11 = vmax.f32 %v1074_v9, 0.0 }
 0x11d   :  { %v1086_v13 = vpop.f32.mrf.mxu2 }
 0x11e   :  { %v1117_v12 = vpack.c.bf16 %v1109_v11, %v1109_v11  ;;  %v1087_v14 = vadd.f32 %v1086_v13, %v239_v10 }
 0x11f   :  { %v1099_v15 = vpop.f32.mrf.mxu3  ;;  %v1062_v16 = vpop.f32.mrf.mxu0 }
 0x120   :  { %1721 = vmatmul.bf16.vlgmr.msrb.gmra.mxu2 %v1117_v12  ;;  %v1100_v18 = vadd.f32 %v1099_v15, %v1087_v14 }
 0x121   :  { %v1075_v17 = vpop.f32.mrf.mxu1 }
 0x122   :  { %v1110_v19 = vmax.f32 %v1100_v18, 0.0 }
 0x124   :  { %v1118_v20 = vpack.c.bf16 %v1110_v19, %v1110_v19 }
 0x125   :  { %v1088_v21 = vpop.f32.mrf.mxu2 }
 0x126   :  { %1734 = vmatmul.bf16.vlgmr.msrb.gmra.mxu3 %v1118_v20 }
 0x127   :  { %v1101_v22 = vpop.f32.mrf.mxu3 }
 0x13d   :  { %v1644_v24 = vpop.f32.mrf.mxu0 }
 0x13e   :  { %v1645_v35 = vadd.f32 %v2852_v23, %v1644_v24 }
 0x143   :  { %v1657_v25 = vpop.f32.mrf.mxu1 }
 0x144   :  { %v1658_v26 = vadd.f32 %v1657_v25, %v1645_v35 }
 0x145   :  { %v1646_v1 = vpop.f32.mrf.mxu0 }
 0x14b   :  { %v1659_v4 = vpop.f32.mrf.mxu1 }
 0x163   :  { %v1670_v27 = vpop.f32.mrf.mxu2 }
 0x164   :  { %v1671_v44 = vadd.f32 %v1670_v27, %v1658_v26 }
 0x169   :  { %v1683_v29 = vpop.f32.mrf.mxu3 }
 0x16a   :  { %v1684_v45 = vadd.f32 %v1683_v29, %v1671_v44 }
 0x16b   :  { %v1672_v31 = vpop.f32.mrf.mxu2 }
 0x171   :  { %v1685_v34 = vpop.f32.mrf.mxu3 }
 0x17d   :  { %v1696_v37 = vpop.f32.mrf.mxu0 }
 0x17e   :  { %v1697_v47 = vadd.f32 %v1696_v37, %v1684_v45 }
 0x183   :  { %v1709_v39 = vpop.f32.mrf.mxu1 }
 0x184   :  { %v1710_v48 = vadd.f32 %v1709_v39, %v1697_v47 }
 0x185   :  { %v1698_v40 = vpop.f32.mrf.mxu0 }
 0x18b   :  { %v1711_v43 = vpop.f32.mrf.mxu1 }
 0x1a3   :  { %v1722_v46 = vpop.f32.mrf.mxu2 }
 0x1a4   :  { %v1723_v49 = vadd.f32 %v1722_v46, %v1710_v48 }
 0x1a9   :  { %v1735_v50 = vpop.f32.mrf.mxu3 }
 0x1aa   :  { %v1736_v51 = vadd.f32 %v1735_v50, %v1723_v49 }
 0x1ab   :  { %v1724_v52 = vpop.f32.mrf.mxu2 }
 0x1ac   :  { %v1739_v53 = vmax.f32 %v1736_v51, 0.0 }
 0x1ae   :  { %v1740_v54 = vpack.c.bf16 %v1739_v53, %v1739_v53 }
 0x1b0   :  { %1817 = vmatmul.bf16.vlgmr.msra.gmra.mxu0 %v1740_v54 }
 0x1b1   :  { %v1737_v55 = vpop.f32.mrf.mxu3 }
 0x22d   :  { %v1818_v57 = vpop.f32.mrf.mxu0 }
 0x22e   :  { %v1819_v58 = vadd.f32 %v2853_v56, %v1818_v57 }
 0x230   :  { %1822 = vst [vmem:[#allocation11] sm:$0xff] %v1819_v58 }
 0x231   :  { %1833 = dma.vmem_to_hbm [thread:$0]  %s1829_s29, 128, %s1831_s9, [#allocation4]  }
 0x235   :  { %v1820_v59 = vpop.f32.mrf.mxu0 }
 0x236   :  { %3004 = dma.done.wait [#allocation4], 128  }
 0x237   :  { %3005 = vsyncadd [#allocation4], 4294967168 }
 0x238   :  { %1838 = vsyncpa [#allocation3], 1 }
 0x239   :  { %1839 = vsyncpa [#allocation6], 1 }
 0x23a   :  { %1840 = vsyncpa [#allocation9], 1 }
 0x23b   :  { %1841 = vsyncpa [#allocation4], 1 }

</bundles_post_ra>
